<compile_context>
chip_gen: v7x
topology: tpu7x:2x2x1
jax: 0.10.0
libtpu: 0.0.40
codegen_flags: <defaults>
</compile_context>

<pallas_src>
import numpy as np
import jax
import jax.numpy as jnp
from jax.experimental import pallas as pl
from jax.experimental.pallas import tpu as pltpu

TWO_PI = 2.0 * np.pi
HALF_PI = 0.5 * np.pi
NUM_EMB_ROWS = 5        # 0..3 -> point_embeddings[0..3], 4 -> not_a_point
NO_ADD_ROW = 5.0        # label-row value meaning "no embedding added"
PARAM_ROWS = 8          # 5 embedding rows + G0' + G1' + bias'


def prompt_encoder_kernel(tok_ref, par_ref, out_ref):
    """One grid step = one block of Bblk batch elements.

    tok_ref : (Bblk, T, 4) f32  [x_norm, y_norm, emb_row, weight]
    par_ref : (8, D)       f32  rows 0..4 = embedding table,
                                row 5 = 4*pi*G[0] duplicated into both halves,
                                row 6 = 4*pi*G[1] duplicated into both halves,
                                row 7 = -2*pi*(G0+G1) | -2*pi*(G0+G1)+pi/2
    out_ref : (Bblk, D)    f32  weighted mean over the T prompt slots
    """
    tok = tok_ref[...]                           # (Bblk, T, 4)
    cx = tok[:, :, 0:1]                          # (Bblk, T, 1)
    cy = tok[:, :, 1:2]
    lab = tok[:, :, 2:3]
    w = tok[:, :, 3:4]

    g0 = par_ref[5:6, :]                         # (1, D)
    g1 = par_ref[6:7, :]
    bias = par_ref[7:8, :]

    # Random-Fourier projection; the second lane half carries a +pi/2 bias so
    # a single sin produces [sin | cos].  VPU FMAs + one EUP dispatch, no MXU.
    proj = cx * g0 + cy * g1 + bias              # (Bblk, T, D)
    pe = jnp.sin(proj)

    # Weighted mean of the positional encodings (one sublane reduce).
    acc = jnp.sum(w * pe, axis=1)                # (Bblk, D)

    # Label embeddings contribute  sum_r c_r * emb[r]  with
    # c_r = sum_t w_t * [lab_t == r]:  5 tiny reduces + 5 (Bblk, D) FMAs.
    for r in range(NUM_EMB_ROWS):
        c_r = jnp.sum(jnp.where(lab == jnp.float32(r), w, 0.0), axis=1)  # (Bblk, 1)
        acc = acc + c_r * par_ref[r:r + 1, :]                            # (Bblk, D)

    out_ref[...] = acc                           # single full-D store per step


def _build_params(key, embed_dim):
    """Deterministic parameter init matching the module's __init__ shapes."""
    k_g, k_e = jax.random.split(key)
    gaussian = jax.random.normal(k_g, (2, embed_dim // 2), jnp.float32)   # scale = 1.0
    emb = jax.random.normal(k_e, (NUM_EMB_ROWS, embed_dim), jnp.float32)
    return {"gaussian": gaussian, "emb": emb}


def _pack_param_buffer(params):
    """Fold PE constants host-side; duplicate into both lane halves with a
    +pi/2 bias on the second half so the kernel's single sin yields [sin|cos]."""
    G = params["gaussian"]                                    # (2, Dh)
    g0 = 2.0 * TWO_PI * G[0]                                  # 4*pi*G0
    g1 = 2.0 * TWO_PI * G[1]                                  # 4*pi*G1
    b = -TWO_PI * (G[0] + G[1])                               # -2*pi*(G0+G1)
    row_g0 = jnp.concatenate([g0, g0])
    row_g1 = jnp.concatenate([g1, g1])
    row_b = jnp.concatenate([b, b + HALF_PI])
    gpack = jnp.stack([row_g0, row_g1, row_b], axis=0)        # (3, D)
    return jnp.concatenate([params["emb"], gpack], axis=0)    # (8, D)


def _round_up(x, m):
    return ((x + m - 1) // m) * m


def _choose_batch_blocking(B):
    """Small B: one full-batch step (the kernel is overhead-dominated, so
    amortize the ~0.35us/step grid cost).  Large B: two sublane-aligned blocks
    so v7x's 2 TensorCores both get work; 'parallel' is a no-op on v5e/v6e."""
    if B >= 16:
        n_steps = 2
        bblk = _round_up((B + 1) // 2, 8)
    else:
        n_steps = 1
        bblk = B
    return bblk, n_steps


def prompt_encoder_forward(params, points=None, boxes=None, *, input_image_size):
    """JAX wrapper reproducing PromptEncoder.forward. Glue only; compute in the kernel."""
    H, W = input_image_size
    D = params["emb"].shape[1]

    if points is None and boxes is None:
        # torch: not_a_point_embed.weight -> (1, 1, D); trivial broadcast, no kernel.
        return jnp.broadcast_to(params["emb"][4][None, None, :], (1, 1, D))

    tok_coords, tok_rows, tok_w = [], [], []
    B = None
    n_slots = 0

    if points is not None:
        coords, labels = points
        coords = coords.astype(jnp.float32) + 0.5
        labels = labels.astype(jnp.int32)
        B = coords.shape[0]
        if boxes is None:  # pad=True branch of _embed_points
            coords = jnp.concatenate(
                [coords, jnp.zeros((B, 1, 2), jnp.float32)], axis=1)
            labels = jnp.concatenate(
                [labels, -jnp.ones((B, 1), jnp.int32)], axis=1)
        n_pts = coords.shape[1]
        # label -> embedding-table row: 1->0, 0->1, -1->4, anything else -> no add
        rows = jnp.full(labels.shape, NO_ADD_ROW, jnp.float32)
        rows = jnp.where(labels == 1, 0.0, rows)
        rows = jnp.where(labels == 0, 1.0, rows)
        rows = jnp.where(labels == -1, 4.0, rows)
        tok_coords.append(coords)
        tok_rows.append(rows)
        tok_w.append(jnp.full((n_pts,), 1.0, jnp.float32))    # each point = one slot
        n_slots += n_pts

    if boxes is not None:
        boxes = boxes.astype(jnp.float32)
        Bb = boxes.shape[0]
        B = Bb if B is None else B
        corners = (boxes + 0.5).reshape(Bb, 2, 2)
        corner_rows = jnp.broadcast_to(jnp.array([[2.0, 3.0]], jnp.float32), (Bb, 2))
        tok_coords.append(corners)
        tok_rows.append(corner_rows)
        tok_w.append(jnp.full((2,), 0.5, jnp.float32))        # box = mean of 2 corners
        n_slots += 1

    coords_all = jnp.concatenate(tok_coords, axis=1)          # (B, T, 2)
    rows_all = jnp.concatenate(tok_rows, axis=1)              # (B, T)
    T = coords_all.shape[1]

    # normalize like forward_with_coords: x / W, y / H
    coords_all = coords_all / jnp.array([W, H], jnp.float32)

    # per-slot mean weights (identical across batch)
    w = jnp.concatenate(tok_w) / float(n_slots)               # (T,)
    w_all = jnp.broadcast_to(w[None, :], (B, T))

    # packed token buffer: [x, y, emb_row, weight]
    tokens = jnp.stack(
        [coords_all[..., 0], coords_all[..., 1], rows_all, w_all], axis=-1)  # (B, T, 4)

    # pad T to a sublane multiple (extra slots: weight 0, no embedding row)
    T_pad = _round_up(T, 8)
    if T_pad > T:
        pad_t = jnp.zeros((B, T_pad - T, 4), jnp.float32).at[:, :, 2].set(NO_ADD_ROW)
        tokens = jnp.concatenate([tokens, pad_t], axis=1)

    # choose batch blocking and pad B if required by the block shape
    bblk, n_steps = _choose_batch_blocking(B)
    B_pad = bblk * n_steps
    if B_pad > B:
        pad_b = jnp.zeros((B_pad - B, T_pad, 4), jnp.float32).at[:, :, 2].set(NO_ADD_ROW)
        tokens = jnp.concatenate([tokens, pad_b], axis=0)

    par = _pack_param_buffer(params)                          # (8, D)

    cost = pl.CostEstimate(
        flops=int(B_pad * T_pad * 8 * D + B_pad * NUM_EMB_ROWS * (2 * D + 2 * T_pad)),
        transcendentals=int(B_pad * T_pad * D),               # one full-D sin per token
        bytes_accessed=int(tokens.size * 4 + par.size * 4 + B_pad * D * 4),
    )

    out2d = pl.pallas_call(
        prompt_encoder_kernel,
        out_shape=jax.ShapeDtypeStruct((B_pad, D), jnp.float32),
        grid_spec=pltpu.PrefetchScalarGridSpec(
            num_scalar_prefetch=0,
            grid=(n_steps,),
            in_specs=[
                pl.BlockSpec((bblk, T_pad, 4), lambda s: (s, 0, 0)),   # batch block
                pl.BlockSpec((PARAM_ROWS, D), lambda s: (0, 0)),       # resident params
            ],
            out_specs=pl.BlockSpec((bblk, D), lambda s: (s, 0)),       # 2-D output slab
        ),
        compiler_params=pltpu.CompilerParams(
            dimension_semantics=("parallel",)),
        cost_estimate=cost,
    )(tokens, par)

    return out2d[:B, None, :]                                 # (B, 1, D)


def reference_forward(params, points, boxes, input_image_size):
    """Pure-JAX reference following the torch code structure exactly
    (projection written elementwise since K=2, avoiding TPU matmul precision)."""
    H, W = input_image_size
    G = params["gaussian"]
    scale = jnp.array([W, H], jnp.float32)

    def pe_enc(c):
        c = 2.0 * c - 1.0
        proj = TWO_PI * (c[..., 0:1] * G[0] + c[..., 1:2] * G[1])
        return jnp.concatenate([jnp.sin(proj), jnp.cos(proj)], axis=-1)

    embs = []
    if points is not None:
        coords, labels = points
        coords = coords.astype(jnp.float32) + 0.5
        labels = labels.astype(jnp.int32)
        if boxes is None:
            coords = jnp.concatenate(
                [coords, jnp.zeros((coords.shape[0], 1, 2), jnp.float32)], axis=1)
            labels = jnp.concatenate(
                [labels, -jnp.ones((labels.shape[0], 1), jnp.int32)], axis=1)
        pe = pe_enc(coords / scale)
        pe = pe + (labels == -1)[..., None] * params["emb"][4]
        pe = pe + (labels == 1)[..., None] * params["emb"][0]
        pe = pe + (labels == 0)[..., None] * params["emb"][1]
        embs.append(pe)
    if boxes is not None:
        corners = (boxes.astype(jnp.float32) + 0.5).reshape(-1, 2, 2)
        ce = pe_enc(corners / scale)
        ce = ce.at[:, 0, :].add(params["emb"][2])
        ce = ce.at[:, 1, :].add(params["emb"][3])
        embs.append(ce.mean(axis=1, keepdims=True))
    return jnp.concatenate(embs, axis=1).mean(axis=1, keepdims=True)


if __name__ == "__main__":
    key = jax.random.PRNGKey(0)
    embed_dim = 64
    input_image_size = (16, 16)
    image_embedding_size = (4, 4)   # not used by forward()
    B, N = 2, 8

    k_params, k_c, k_l = jax.random.split(key, 3)
    params = _build_params(k_params, embed_dim)

    coords = jax.random.uniform(k_c, (B, N, 2), jnp.float32) * 15.0
    labels = jax.random.randint(k_l, (B, N), -1, 2)            # values in {-1, 0, 1}
    boxes = jnp.array([[1.0, 2.0, 10.0, 12.0],
                       [0.0, 0.0, 15.0, 15.0]], jnp.float32)   # (B, 4)

    # points + boxes
    out = prompt_encoder_forward(params, points=(coords, labels), boxes=boxes,
                                 input_image_size=input_image_size)
    out = jax.block_until_ready(out)
    ref = reference_forward(params, (coords, labels), boxes, input_image_size)
    assert out.shape == (B, 1, embed_dim)
    np.testing.assert_allclose(np.asarray(out), np.asarray(ref), rtol=5e-5, atol=5e-5)

    # points only (exercises the pad=True branch)
    out_p = prompt_encoder_forward(params, points=(coords, labels), boxes=None,
                                   input_image_size=input_image_size)
    out_p = jax.block_until_ready(out_p)
    ref_p = reference_forward(params, (coords, labels), None, input_image_size)
    np.testing.assert_allclose(np.asarray(out_p), np.asarray(ref_p), rtol=5e-5, atol=5e-5)

    print("KERNEL_OK")
</pallas_src>

<mosaic_0001>
module attributes {stable_mosaic.version = 11 : i64} {
  func.func @prompt_encoder_kernel(%arg0: i32, %arg1: memref<2x16x4xf32, #tpu.memory_space<vmem>>, %arg2: memref<8x64xf32, #tpu.memory_space<vmem>>, %arg3: memref<2x64xf32, #tpu.memory_space<vmem>>) attributes {dimension_semantics = [#tpu.dimension_semantics<parallel>], iteration_bounds = array<i64: 1>, scalar_prefetch = 0 : i64, scratch_operands = 0 : i64, tpu.core_type = #tpu.core_type<tc>, window_params = [{transform_indices = @transform_0, window_bounds = array<i64: 2, 16, 4>}, {pipeline_mode = #tpu.pipeline_mode<synchronous>, transform_indices = @transform_1, window_bounds = array<i64: 8, 64>}, {transform_indices = @transform_2, window_bounds = array<i64: 2, 64>}]} {
    %c0 = arith.constant 0 : index
    %c0_0 = arith.constant 0 : index
    %c0_1 = arith.constant 0 : index
    %0 = vector.load %arg1[%c0, %c0_0, %c0_1] : memref<2x16x4xf32, #tpu.memory_space<vmem>>, vector<2x16x4xf32>
    %1 = vector.extract_strided_slice %0 {offsets = [0, 0, 0], sizes = [2, 16, 1], strides = [1, 1, 1]} : vector<2x16x4xf32> to vector<2x16x1xf32>
    %2 = vector.extract_strided_slice %0 {offsets = [0, 0, 1], sizes = [2, 16, 1], strides = [1, 1, 1]} : vector<2x16x4xf32> to vector<2x16x1xf32>
    %3 = vector.extract_strided_slice %0 {offsets = [0, 0, 2], sizes = [2, 16, 1], strides = [1, 1, 1]} : vector<2x16x4xf32> to vector<2x16x1xf32>
    %4 = vector.extract_strided_slice %0 {offsets = [0, 0, 3], sizes = [2, 16, 1], strides = [1, 1, 1]} : vector<2x16x4xf32> to vector<2x16x1xf32>
    %c5 = arith.constant 5 : index
    %c0_2 = arith.constant 0 : index
    %5 = vector.load %arg2[%c5, %c0_2] : memref<8x64xf32, #tpu.memory_space<vmem>>, vector<1x64xf32>
    %c6 = arith.constant 6 : index
    %c0_3 = arith.constant 0 : index
    %6 = vector.load %arg2[%c6, %c0_3] : memref<8x64xf32, #tpu.memory_space<vmem>>, vector<1x64xf32>
    %c7 = arith.constant 7 : index
    %c0_4 = arith.constant 0 : index
    %7 = vector.load %arg2[%c7, %c0_4] : memref<8x64xf32, #tpu.memory_space<vmem>>, vector<1x64xf32>
    %8 = vector.shape_cast %5 : vector<1x64xf32> to vector<1x1x64xf32>
    %9 = vector.broadcast %1 : vector<2x16x1xf32> to vector<2x16x64xf32>
    %10 = vector.broadcast %8 : vector<1x1x64xf32> to vector<2x16x64xf32>
    %11 = arith.mulf %9, %10 : vector<2x16x64xf32>
    %12 = vector.shape_cast %6 : vector<1x64xf32> to vector<1x1x64xf32>
    %13 = vector.broadcast %2 : vector<2x16x1xf32> to vector<2x16x64xf32>
    %14 = vector.broadcast %12 : vector<1x1x64xf32> to vector<2x16x64xf32>
    %15 = arith.mulf %13, %14 : vector<2x16x64xf32>
    %16 = arith.addf %11, %15 : vector<2x16x64xf32>
    %17 = vector.shape_cast %7 : vector<1x64xf32> to vector<1x1x64xf32>
    %18 = vector.broadcast %17 : vector<1x1x64xf32> to vector<2x16x64xf32>
    %19 = arith.addf %16, %18 : vector<2x16x64xf32>
    %20 = math.sin %19 : vector<2x16x64xf32>
    %21 = vector.broadcast %4 : vector<2x16x1xf32> to vector<2x16x64xf32>
    %22 = arith.mulf %21, %20 : vector<2x16x64xf32>
    %cst = arith.constant dense<0.000000e+00> : vector<2x64xf32>
    %23 = vector.multi_reduction <add>, %22, %cst [1] : vector<2x16x64xf32> to vector<2x64xf32>
    %cst_5 = arith.constant 0.000000e+00 : f32
    %24 = vector.broadcast %cst_5 : f32 to vector<2x16x1xf32>
    %25 = arith.cmpf oeq, %3, %24 : vector<2x16x1xf32>
    %cst_6 = arith.constant 0.000000e+00 : f32
    %26 = vector.broadcast %cst_6 : f32 to vector<2x16x1xf32>
    %27 = arith.select %25, %4, %26 : vector<2x16x1xi1>, vector<2x16x1xf32>
    %cst_7 = arith.constant dense<0.000000e+00> : vector<2x1xf32>
    %28 = vector.multi_reduction <add>, %27, %cst_7 [1] : vector<2x16x1xf32> to vector<2x1xf32>
    %c0_8 = arith.constant 0 : index
    %c0_9 = arith.constant 0 : index
    %29 = vector.load %arg2[%c0_8, %c0_9] : memref<8x64xf32, #tpu.memory_space<vmem>>, vector<1x64xf32>
    %30 = vector.broadcast %28 : vector<2x1xf32> to vector<2x64xf32>
    %31 = vector.broadcast %29 : vector<1x64xf32> to vector<2x64xf32>
    %32 = arith.mulf %30, %31 : vector<2x64xf32>
    %33 = arith.addf %23, %32 : vector<2x64xf32>
    %cst_10 = arith.constant 1.000000e+00 : f32
    %34 = vector.broadcast %cst_10 : f32 to vector<2x16x1xf32>
    %35 = arith.cmpf oeq, %3, %34 : vector<2x16x1xf32>
    %cst_11 = arith.constant 0.000000e+00 : f32
    %36 = vector.broadcast %cst_11 : f32 to vector<2x16x1xf32>
    %37 = arith.select %35, %4, %36 : vector<2x16x1xi1>, vector<2x16x1xf32>
    %cst_12 = arith.constant dense<0.000000e+00> : vector<2x1xf32>
    %38 = vector.multi_reduction <add>, %37, %cst_12 [1] : vector<2x16x1xf32> to vector<2x1xf32>
    %c1 = arith.constant 1 : index
    %c0_13 = arith.constant 0 : index
    %39 = vector.load %arg2[%c1, %c0_13] : memref<8x64xf32, #tpu.memory_space<vmem>>, vector<1x64xf32>
    %40 = vector.broadcast %38 : vector<2x1xf32> to vector<2x64xf32>
    %41 = vector.broadcast %39 : vector<1x64xf32> to vector<2x64xf32>
    %42 = arith.mulf %40, %41 : vector<2x64xf32>
    %43 = arith.addf %33, %42 : vector<2x64xf32>
    %cst_14 = arith.constant 2.000000e+00 : f32
    %44 = vector.broadcast %cst_14 : f32 to vector<2x16x1xf32>
    %45 = arith.cmpf oeq, %3, %44 : vector<2x16x1xf32>
    %cst_15 = arith.constant 0.000000e+00 : f32
    %46 = vector.broadcast %cst_15 : f32 to vector<2x16x1xf32>
    %47 = arith.select %45, %4, %46 : vector<2x16x1xi1>, vector<2x16x1xf32>
    %cst_16 = arith.constant dense<0.000000e+00> : vector<2x1xf32>
    %48 = vector.multi_reduction <add>, %47, %cst_16 [1] : vector<2x16x1xf32> to vector<2x1xf32>
    %c2 = arith.constant 2 : index
    %c0_17 = arith.constant 0 : index
    %49 = vector.load %arg2[%c2, %c0_17] : memref<8x64xf32, #tpu.memory_space<vmem>>, vector<1x64xf32>
    %50 = vector.broadcast %48 : vector<2x1xf32> to vector<2x64xf32>
    %51 = vector.broadcast %49 : vector<1x64xf32> to vector<2x64xf32>
    %52 = arith.mulf %50, %51 : vector<2x64xf32>
    %53 = arith.addf %43, %52 : vector<2x64xf32>
    %cst_18 = arith.constant 3.000000e+00 : f32
    %54 = vector.broadcast %cst_18 : f32 to vector<2x16x1xf32>
    %55 = arith.cmpf oeq, %3, %54 : vector<2x16x1xf32>
    %cst_19 = arith.constant 0.000000e+00 : f32
    %56 = vector.broadcast %cst_19 : f32 to vector<2x16x1xf32>
    %57 = arith.select %55, %4, %56 : vector<2x16x1xi1>, vector<2x16x1xf32>
    %cst_20 = arith.constant dense<0.000000e+00> : vector<2x1xf32>
    %58 = vector.multi_reduction <add>, %57, %cst_20 [1] : vector<2x16x1xf32> to vector<2x1xf32>
    %c3 = arith.constant 3 : index
    %c0_21 = arith.constant 0 : index
    %59 = vector.load %arg2[%c3, %c0_21] : memref<8x64xf32, #tpu.memory_space<vmem>>, vector<1x64xf32>
    %60 = vector.broadcast %58 : vector<2x1xf32> to vector<2x64xf32>
    %61 = vector.broadcast %59 : vector<1x64xf32> to vector<2x64xf32>
    %62 = arith.mulf %60, %61 : vector<2x64xf32>
    %63 = arith.addf %53, %62 : vector<2x64xf32>
    %cst_22 = arith.constant 4.000000e+00 : f32
    %64 = vector.broadcast %cst_22 : f32 to vector<2x16x1xf32>
    %65 = arith.cmpf oeq, %3, %64 : vector<2x16x1xf32>
    %cst_23 = arith.constant 0.000000e+00 : f32
    %66 = vector.broadcast %cst_23 : f32 to vector<2x16x1xf32>
    %67 = arith.select %65, %4, %66 : vector<2x16x1xi1>, vector<2x16x1xf32>
    %cst_24 = arith.constant dense<0.000000e+00> : vector<2x1xf32>
    %68 = vector.multi_reduction <add>, %67, %cst_24 [1] : vector<2x16x1xf32> to vector<2x1xf32>
    %c4 = arith.constant 4 : index
    %c0_25 = arith.constant 0 : index
    %69 = vector.load %arg2[%c4, %c0_25] : memref<8x64xf32, #tpu.memory_space<vmem>>, vector<1x64xf32>
    %70 = vector.broadcast %68 : vector<2x1xf32> to vector<2x64xf32>
    %71 = vector.broadcast %69 : vector<1x64xf32> to vector<2x64xf32>
    %72 = arith.mulf %70, %71 : vector<2x64xf32>
    %73 = arith.addf %63, %72 : vector<2x64xf32>
    %c0_26 = arith.constant 0 : index
    %c0_27 = arith.constant 0 : index
    %74 = vector.load %arg3[%c0_26, %c0_27] : memref<2x64xf32, #tpu.memory_space<vmem>>, vector<2x64xf32>
    tpu.vector_store %arg3[%c0_26, %c0_27], %73 {strides = array<i32>} : memref<2x64xf32, #tpu.memory_space<vmem>>, vector<2x64xf32>,
    return
  }
  func.func @transform_0(%arg0: i32) -> (i32, i32, i32) {
    %c0_i32 = arith.constant 0 : i32
    %c0_i32_0 = arith.constant 0 : i32
    %c0_i32_1 = arith.constant 0 : i32
    return %arg0, %c0_i32, %c0_i32_0 : i32, i32, i32
  }
  func.func @transform_1(%arg0: i32) -> (i32, i32) {
    %c0_i32 = arith.constant 0 : i32
    %c0_i32_0 = arith.constant 0 : i32
    %c0_i32_1 = arith.constant 0 : i32
    return %c0_i32, %c0_i32_0 : i32, i32
  }
  func.func @transform_2(%arg0: i32) -> (i32, i32) {
    %c0_i32 = arith.constant 0 : i32
    %c0_i32_0 = arith.constant 0 : i32
    return %arg0, %c0_i32 : i32, i32
  }
}

</mosaic_0001>

<bundles_post_ra>
// kernel: tpu_custom_call.1
= control target key start
LH: loop header
LB: loop body
LE: loop exit
PB: predicated region body
PF: predicated region fallthrough
CT: control target
= control target key end

     0   :  { %v899_v1 = vmov 1   ;;  %v900_v2 = vmov 0   ;;  %s1471_s0 = inlined_call_operand.vmem [shape: f32[2,16,4], index: 0, kind: input, shape index: {}]   ;;  %s1472_s1 = inlined_call_operand.vmem [shape: f32[8,64], index: 1, kind: input, shape index: {}]   ;;  %s1473_s2 = inlined_call_operand.hbm [shape: f32[2,64], index: 2, kind: output, shape index: {}]  }
   0x1   :  { %v929_v0 = vld [vmem:[%s1471_s0 + $0x10] sm:$0xff]  ;;  %851 = vset.pattern.permute.xlu1 %v899_v1  ;;  %850 = vset.pattern.permute.xlu0 %v900_v2 }
   0x2   :  { %56 = vperm.xlu1 %851, %v929_v0   ;;  %31 = vperm.xlu0 %850, %v929_v0  }
   0x3   :  { %7 = vsyncpa [#allocation3], 0  ;;  %v936_v3 = vld [vmem:[%s1471_s0 + $0x18] sm:$0xff]  ;;  %v943_v4 = vld [vmem:[%s1471_s0] sm:$0xff]  ;;  %s901_s17 = smov 127   ;;  %v902_v6 = vmov 3  }
   0x4   :  { %v948_v5 = vld [vmem:[%s1471_s0 + $0x8] sm:$0xff]  ;;  %v903_v7 = vmov 2   ;;  %v799_v8 = vld [vmem:[%s1472_s1 + $0x6] ss:$0 sm:$0xff]  ;;  %v798_v9 = vld [vmem:[%s1472_s1 + $0x5] ss:$0 sm:$0xff] }
   0x5   :  { %v971_v14 = vld [vmem:[%s1472_s1 + $0x7] ss:$0 sm:$0xff]  ;;  %vm540_vm0 = vcmp.eq.f32.partialorder %v929_v0, 0.0  ;;  %vm598_vm1 = vcmp.eq.f32.partialorder %v929_v0, 1.0  ;;  %vm643_vm2 = vcmp.eq.f32.partialorder %v929_v0, 2.0  ;;  %vm688_vm3 = vcmp.eq.f32.partialorder %v929_v0, 3.0 }
   0x6   :  { %60 = vperm.xlu1 %851, %v936_v3   ;;  %36 = vperm.xlu0 %850, %v936_v3   ;;  %vm541_vm4 = vcmp.eq.f32.partialorder %v936_v3, 0.0  ;;  %vm558_vm5 = vcmask 23568   ;;  %vm599_vm7 = vcmp.eq.f32.partialorder %v936_v3, 1.0  ;;  %vm644_vm9 = vcmp.eq.f32.partialorder %v936_v3, 2.0  ;;  %s910_s5 = smov [#allocation2]  }
   0x7   :  { %vm538_vm11 = vcmp.eq.f32.partialorder %v943_v4, 0.0  ;;  %vm596_vm12 = vcmp.eq.f32.partialorder %v943_v4, 1.0  ;;  %vm686_vm15 = vcmp.eq.f32.partialorder %v943_v4, 3.0  ;;  %vm731_vm10 = vcmp.eq.f32.partialorder %v943_v4, 4.0  ;;  %s790_s6 = sshll.u32 %s910_s5, 4  ;;  %s791_s6 = int_to_ptr.vmem [resolvable:$true] %s790_s6 }
   0x8   :  { %vm597_vm13 = vcmp.eq.f32.partialorder %v948_v5, 1.0  ;;  %vm642_vm14 = vcmp.eq.f32.partialorder %v948_v5, 2.0  ;;  %p880_p1 = scmp.lt.s32.totalorder %s791_s6, %s791_s6 }
   0xa   :  { %852 = vset.pattern.permute.xlu1 %v900_v2  ;;  %21 = vperm.xlu0 %850, %v943_v4  }
   0xb   :  { %26 = vperm.xlu1 %852, %v948_v5  }
   0xe   :  { %853 = vset.pattern.permute.xlu0 %v899_v1 }
   0xf   :  { %854 = vset.pattern.permute.xlu1 %v899_v1  ;;  %48 = vperm.xlu0 %853, %v943_v4  }
  0x10   :  { %52 = vperm.xlu1 %854, %v948_v5  }
  0x13   :  { %548 = vrot.lane.b32.xlu0 %v936_v3, %s901_s17 }
  0x14   :  { %546 = vrot.lane.b32.xlu1 %v929_v0, %s901_s17  ;;  %856 = vset.pattern.permute.xlu0 %v902_v6 }
  0x15   :  { %855 = vset.pattern.permute.xlu1 %v902_v6 }
  0x17   :  { %544 = vrot.lane.b32.xlu0 %v948_v5, %s901_s17 }
  0x18   :  { %542 = vrot.lane.b32.xlu1 %v943_v4, %s901_s17 }
  0x1b   :  { %512 = vperm.xlu0 %856, %v936_v3  }
  0x1c   :  { %508 = vperm.xlu1 %855, %v929_v0  }
  0x1f   :  { %857 = vset.pattern.permute.xlu0 %v903_v7 }
  0x20   :  { %500 = vperm.xlu1 %855, %v943_v4  }
  0x24   :  { %504 = vperm.xlu1 %855, %v948_v5  }
  0x28   :  { %858 = vset.pattern.permute.xlu1 %v903_v7 }
  0x81   :  { %v57_v10 = vpop.permute.xlu1 %56  ;;  %v32_v11 = vpop.permute.xlu0 %31 }
  0x82   :  { %v69_v12 = vmul.f32 %v799_v8, %v57_v10  ;;  %v45_v13 = vmul.f32 %v798_v9, %v32_v11 }
  0x84   :  { %v73_v15 = vadd.f32 %v69_v12, %v45_v13 }
  0x85   :  { %v61_v16 = vpop.permute.xlu1 %60  ;;  %v37_v17 = vpop.permute.xlu0 %36 }
  0x86   :  { %v974_v18 = vadd.f32 %v971_v14, %v73_v15  ;;  %v70_v19 = vmul.f32 %v799_v8, %v61_v16  ;;  %v46_v20 = vmul.f32 %v798_v9, %v37_v17 }
  0x88   :  { %v294_v21 = vand.u32 2139095040, %v974_v18  ;;  %v74_v22 = vadd.f32 %v70_v19, %v46_v20  ;;  %v291_v27 = vand.u32 2147483647, %v974_v18 }
  0x89   :  { %v22_v23 = vpop.permute.xlu0 %21 }
  0x8a   :  { %v295_v24 = vshrl.u32 %v294_v21, 23  ;;  %v978_v25 = vadd.f32 %v971_v14, %v74_v22  ;;  %v27_v26 = vpop.permute.xlu1 %26  ;;  %v298_v33 = vand.u32 8388607, %v291_v27  ;;  %v43_v34 = vmul.f32 %v798_v9, %v22_v23 }
  0x8b   :  { %v44_v35 = vmul.f32 %v798_v9, %v27_v26 }
  0x8c   :  { %v809_v28 = vadd.s32 4294967169, %v295_v24  ;;  %v398_v29 = vand.u32 2139095040, %v978_v25  ;;  %v395_v40 = vand.u32 2147483647, %v978_v25  ;;  %v299_v44 = vor.u32 8388608, %v298_v33 }
  0x8e   :  { %v301_v30 = vadd.s32 1, %v809_v28  ;;  %v399_v31 = vshrl.u32 %v398_v29, 23  ;;  %v49_v32 = vpop.permute.xlu0 %48  ;;  %v1005_v48 = vand.u32 8388607, %v395_v40  ;;  %v1013_v53 = vshll.u32 %v299_v44, 8 }
  0x8f   :  { %v67_v36 = vmul.f32 %v799_v8, %v49_v32  ;;  %v53_v37 = vpop.permute.xlu1 %52 }
  0x90   :  { %vm302_vm8 = vcmp.gt.s32.totalorder %v301_v30, 0  ;;  %v813_v38 = vadd.s32 4294967169, %v399_v31  ;;  %v68_v39 = vmul.f32 %v799_v8, %v53_v37  ;;  %v403_v61 = vor.u32 8388608, %v1005_v48 }
  0x91   :  { %v71_v41 = vadd.f32 %v67_v36, %v43_v34  ;;  %v303_v45 = vsel %vm302_vm8, %v301_v30, 0  ;;  %vm732_vm8 = vcmp.eq.f32.partialorder %v948_v5, 4.0 }
  0x92   :  { %v405_v42 = vadd.s32 1, %v813_v38  ;;  %v72_v43 = vadd.f32 %v68_v39, %v44_v35  ;;  %v549_v51 = vpop.permute.xlu0 %548  ;;  %v1010_v52 = vand.u32 31, %v303_v45  ;;  %v1024_v58 = vshrl.u32 %v303_v45, 5 }
  0x93   :  { %v998_v46 = vadd.f32 %v971_v14, %v71_v41  ;;  %v547_v47 = vpop.permute.xlu1 %546  ;;  %v557_v60 = vsel %vm541_vm4, %v549_v51, 0.0  ;;  %v603_v1 = vsel %vm599_vm7, %v549_v51, 0.0  ;;  %v648_v2 = vsel %vm644_vm9, %v549_v51, 0.0 }
  0x94   :  { %vm406_vm6 = vcmp.gt.s32.totalorder %v405_v42, 0  ;;  %v1018_v56 = vadd.f32 %v971_v14, %v72_v43  ;;  %v556_v57 = vsel %vm540_vm0, %v547_v47, 0.0  ;;  %v602_v59 = vsel %vm598_vm1, %v547_v47, 0.0 }
  0x95   :  { %v407_v49 = vsel %vm406_vm6, %v405_v42, 0  ;;  %v86_v50 = vand.u32 2139095040, %v998_v46  ;;  %vm687_vm6 = vcmp.eq.f32.partialorder %v948_v5, 3.0  ;;  %v647_v62 = vsel %vm643_vm2, %v547_v47, 0.0 }
  0x96   :  { %v1015_v54 = vand.u32 31, %v407_v49  ;;  %v692_v63 = vsel %vm688_vm3, %v547_v47, 0.0  ;;  %v1040_v7 = vsub.s32 32, %v1010_v52  ;;  %v1042_v8 = vshrl.u32 %v407_v49, 5  ;;  %v545_v23 = vpop.permute.xlu0 %544 }
  0x97   :  { %v87_v55 = vshrl.u32 %v86_v50, 23  ;;  %v543_v6 = vpop.permute.xlu1 %542  ;;  %v568_v9 = vsel %vm558_vm5, %v556_v57, 0.0  ;;  %vm1474_vm0 = vcmp.eq.f32.partialorder %v929_v0, 4.0  ;;  %v190_v13 = vand.u32 2139095040, %v1018_v56 }
  0x98   :  { %v737_v10 = vsel %vm1474_vm0, %v547_v47, 0.0  ;;  %v1048_v11 = vsub.s32 32, %v1015_v54  ;;  %v613_v14 = vsel %vm558_vm5, %v602_v59, 0.0  ;;  %v658_v15 = vsel %vm558_vm5, %v647_v62, 0.0 }
  0x99   :  { %v801_v12 = vadd.s32 4294967169, %v87_v55  ;;  %v1054_v16 = vsel %vm558_vm5, %v692_v63, 0.0  ;;  %vm1475_vm1 = vcmp.eq.f32.partialorder %v936_v3, 3.0  ;;  %v554_v0 = vsel %vm538_vm11, %v543_v6, 0.0 }
  0x9a   :  { %v693_v17 = vsel %vm1475_vm1, %v549_v51, 0.0  ;;  %v1061_v19 = vsel %vm558_vm5, %v737_v10, 0.0  ;;  %v569_v20 = vsel %vm558_vm5, %v557_v60, 0.0  ;;  %v600_v21 = vsel %vm596_vm12, %v543_v6, 0.0 }
  0x9b   :  { %vm1476_vm2 = vcmp.eq.f32.partialorder %v943_v4, 2.0  ;;  %v614_v24 = vsel %vm558_vm5, %v603_v1, 0.0  ;;  %v659_v26 = vsel %vm558_vm5, %v648_v2, 0.0  ;;  %vm1477_vm3 = vcmp.eq.f32.partialorder %v936_v3, 4.0 }
  0x9c   :  { %v645_v22 = vsel %vm1476_vm2, %v543_v6, 0.0  ;;  %v1072_v28 = vsel %vm1477_vm3, %v549_v51, 0.0  ;;  %v690_v29 = vsel %vm686_vm15, %v543_v6, 0.0  ;;  %v1076_v30 = vadd.s32 1, %v801_v12 }
  0x9d   :  { %v1079_v31 = vsel %vm558_vm5, %v693_v17, 0.0  ;;  %v559_v32 = vsel %vm558_vm5, %v554_v0, 0.0  ;;  %v735_v33 = vsel %vm731_vm10, %v543_v6, 0.0  ;;  %v604_v34 = vsel %vm558_vm5, %v600_v21, 0.0 }
  0x9e   :  { %v649_v35 = vsel %vm558_vm5, %v645_v22, 0.0  ;;  %vm1478_vm4 = vcmp.eq.f32.partialorder %v948_v5, 0.0  ;;  %v601_v36 = vsel %vm597_vm13, %v545_v23, 0.0  ;;  %v694_v37 = vsel %vm558_vm5, %v690_v29, 0.0 }
  0x9f   :  { %v555_v3 = vsel %vm1478_vm4, %v545_v23, 0.0  ;;  %v605_v39 = vsel %vm558_vm5, %v601_v36, 0.0  ;;  %v646_v4 = vsel %vm642_vm14, %v545_v23, 0.0  ;;  %v739_v41 = vsel %vm558_vm5, %v735_v33, 0.0 }
  0xa0   :  { %v560_v38 = vsel %vm558_vm5, %v555_v3, 0.0  ;;  %v650_v42 = vsel %vm558_vm5, %v646_v4, 0.0  ;;  %v691_v43 = vsel %vm687_vm6, %v545_v23, 0.0  ;;  %v736_v44 = vsel %vm732_vm8, %v545_v23, 0.0 }
  0xa1   :  { %v695_v45 = vsel %vm558_vm5, %v691_v43, 0.0  ;;  %v740_v47 = vsel %vm558_vm5, %v736_v44, 0.0  ;;  %v570_v49 = vadd.f32 %v569_v20, %v568_v9  ;;  %v606_v50 = vadd.f32 %v605_v39, %v604_v34 }
  0xa2   :  { %vm94_vm7 = vcmp.gt.s32.totalorder %v1076_v30, 0  ;;  %v561_v51 = vadd.f32 %v560_v38, %v559_v32  ;;  %v651_v55 = vadd.f32 %v650_v42, %v649_v35  ;;  %v615_v57 = vadd.f32 %v614_v24, %v613_v14 }
  0xa3   :  { %v696_v59 = vadd.f32 %v695_v45, %v694_v37  ;;  %v571_v60 = vrot.slane %v570_v49, 4  ;;  %v607_v62 = vrot.slane %v606_v50, 4  ;;  %v660_v63 = vadd.f32 %v659_v26, %v658_v15 }
  0xa4   :  { %v741_v1 = vadd.f32 %v740_v47, %v739_v41  ;;  %v562_v2 = vrot.slane %v561_v51, 4  ;;  %v652_v6 = vrot.slane %v651_v55, 4  ;;  %v616_v5 = vrot.slane %v615_v57, 4 }
  0xa5   :  { %v697_v10 = vrot.slane %v696_v59, 4  ;;  %v572_v12 = vadd.f32 %v571_v60, %v570_v49  ;;  %v608_v17 = vadd.f32 %v607_v62, %v606_v50  ;;  %v661_v0 = vrot.slane %v660_v63, 4 }
  0xa6   :  { %v742_v21 = vrot.slane %v741_v1, 4  ;;  %v563_v9 = vadd.f32 %v562_v2, %v561_v51  ;;  %v653_v20 = vadd.f32 %v652_v6, %v651_v55  ;;  %v617_v22 = vadd.f32 %v616_v5, %v615_v57 }
  0xa7   :  { %v698_v23 = vadd.f32 %v697_v10, %v696_v59  ;;  %v573_v29 = vrot.slane %v572_v12, 2  ;;  %v609_v32 = vrot.slane %v608_v17, 2  ;;  %v662_v14 = vadd.f32 %v661_v0, %v660_v63 }
  0xa8   :  { %v743_v24 = vadd.f32 %v742_v21, %v741_v1  ;;  %v564_v33 = vrot.slane %v563_v9, 2  ;;  %v654_v34 = vrot.slane %v653_v20, 2  ;;  %v618_v15 = vrot.slane %v617_v22, 2 }
  0xa9   :  { %v699_v26 = vrot.slane %v698_v23, 2  ;;  %v574_v35 = vadd.f32 %v573_v29, %v572_v12  ;;  %v610_v3 = vadd.f32 %v609_v32, %v608_v17  ;;  %v663_v36 = vrot.slane %v662_v14, 2 }
  0xaa   :  { %v744_v37 = vrot.slane %v743_v24, 2  ;;  %v565_v38 = vadd.f32 %v564_v33, %v563_v9  ;;  %v655_v39 = vadd.f32 %v654_v34, %v653_v20  ;;  %v619_v4 = vadd.f32 %v618_v15, %v617_v22 }
  0xab   :  { %v1104_v41 = vadd.f32 %v699_v26, %v698_v23  ;;  %v575_v42 = vrot.slane %v574_v35, 1  ;;  %v611_v43 = vrot.slane %v610_v3, 1  ;;  %v664_v44 = vadd.f32 %v663_v36, %v662_v14 }
  0xac   :  { %v1106_v45 = vadd.f32 %v744_v37, %v743_v24  ;;  %v749_v47 = vsel %vm558_vm5, %v1072_v28, 0.0  ;;  %v566_v49 = vrot.slane %v565_v38, 1  ;;  %v656_v50 = vrot.slane %v655_v39, 1 }
  0xad   :  { %v620_v51 = vrot.slane %v619_v4, 1  ;;  %v1113_v55 = vsel %vm94_vm7, %v1076_v30, 0  ;;  %v576_v57 = vadd.f32 %v575_v42, %v574_v35  ;;  %v701_v59 = vrot.slane %v1104_v41, 1 }
  0xae   :  { %v665_v60 = vrot.slane %v664_v44, 1  ;;  %v612_v62 = vadd.f32 %v611_v43, %v610_v3  ;;  %v567_v63 = vadd.f32 %v566_v49, %v565_v38  ;;  %v657_v1 = vadd.f32 %v656_v50, %v655_v39 }
  0xaf   :  { %v746_v2 = vrot.slane %v1106_v45, 1  ;;  %585 = vperm.xlu0 %857, %v576_v57   ;;  %v621_v6 = vadd.f32 %v620_v51, %v619_v4  ;;  %v705_v5 = vadd.f32 %v1079_v31, %v1054_v16  ;;  %v750_v10 = vadd.f32 %v749_v47, %v1061_v19 }
  0xb0   :  { %v666_v28 = vadd.f32 %v665_v60, %v664_v44  ;;  %580 = vperm.xlu1 %858, %v567_v63   ;;  %v904_v30 = vmov 683565275   ;;  %v905_v0 = vmov 2475754826   ;;  %v906_v16 = vmov 2131351028  }
  0xb1   :  { %v307_v12 = vshrl.u32 %v904_v30, %v1040_v7  ;;  %v308_v17 = vshll.u32 %v904_v30, %v1010_v52  ;;  %v309_v21 = vshrl.u32 %v905_v0, %v1040_v7  ;;  %v311_v9 = vshll.u32 %v905_v0, %v1010_v52 }
  0xb2   :  { %v706_v20 = vrot.slane %v705_v5, 4  ;;  %v751_v22 = vrot.slane %v750_v10, 4  ;;  %v312_v19 = vshrl.u32 %v906_v16, %v1040_v7  ;;  %v314_v31 = vshll.u32 %v906_v16, %v1010_v52 }
  0xb3   :  { %v310_v23 = vor.u32 %v309_v21, %v308_v17  ;;  %v907_v29 = vmov 2102212464   ;;  %v908_v24 = vmov 920167782   ;;  %625 = vperm.xlu0 %857, %v612_v62   ;;  %v909_v37 = vmov 1326507024  }
  0xb4   :  { %v315_v32 = vshrl.u32 %v907_v29, %v1040_v7  ;;  %v317_v14 = vshll.u32 %v907_v29, %v1010_v52  ;;  %v318_v33 = vshrl.u32 %v908_v24, %v1040_v7  ;;  %v707_v34 = vadd.f32 %v706_v20, %v705_v5  ;;  %630 = vperm.xlu1 %858, %v621_v6  }
  0xb5   :  { %v752_v15 = vadd.f32 %v751_v22, %v750_v10  ;;  %v313_v26 = vor.u32 %v312_v19, %v311_v9  ;;  %v320_v35 = vshll.u32 %v908_v24, %v1010_v52  ;;  %v321_v38 = vshrl.u32 %v909_v37, %v1040_v7 }
  0xb6   :  { %v316_v3 = vor.u32 %v315_v32, %v314_v31  ;;  %v319_v36 = vor.u32 %v318_v33, %v317_v14  ;;  %vm323_vm5 = vcmp.lt.s32.totalorder %v1024_v58, 1  ;;  %v708_v39 = vrot.slane %v707_v34, 2 }
  0xb7   :  { %v753_v4 = vrot.slane %v752_v15, 2  ;;  %vm324_vm9 = vcmp.lt.s32.totalorder %v1024_v58, 2  ;;  %vm325_vm10 = vcmp.lt.s32.totalorder %v1024_v58, 3  ;;  %v322_v42 = vor.u32 %v321_v38, %v320_v35  ;;  %670 = vperm.xlu0 %857, %v657_v1  }
  0xb8   :  { %vm326_vm11 = vcmp.lt.s32.totalorder %v1024_v58, 4  ;;  %v327_v52 = vsel %vm323_vm5, %v307_v12, %v310_v23  ;;  %v331_v43 = vsel %vm323_vm5, %v310_v23, %v313_v26  ;;  %v709_v44 = vadd.f32 %v708_v39, %v707_v34  ;;  %675 = vperm.xlu1 %858, %v666_v28  }
  0xb9   :  { %v754_v7 = vadd.f32 %v753_v4, %v752_v15  ;;  %v328_v47 = vsel %vm326_vm11, %v316_v3, 2102212464  ;;  %v332_v49 = vsel %vm326_vm11, %v319_v36, 920167782  ;;  %v335_v57 = vsel %vm323_vm5, %v313_v26, %v316_v3 }
  0xba   :  { %v329_v50 = vsel %vm325_vm10, %v313_v26, %v328_v47  ;;  %v333_v51 = vsel %vm325_vm10, %v316_v3, %v332_v49  ;;  %v336_v60 = vsel %vm326_vm11, %v322_v42, 1326507024  ;;  %v702_v62 = vadd.f32 %v701_v59, %v1104_v41 }
  0xbb   :  { %v710_v63 = vrot.slane %v709_v44, 1  ;;  %v755_v6 = vrot.slane %v754_v7, 1  ;;  %v334_v1 = vsel %vm324_vm9, %v331_v43, %v333_v51  ;;  %v747_v5 = vadd.f32 %v746_v2, %v1106_v45 }
  0xbc   :  { %v337_v28 = vsel %vm325_vm10, %v319_v36, %v336_v60  ;;  %v1163_v10 = vmul.u32.u64.low %v1013_v53, %v334_v1  ;;  %v1164_v12 = vmul.u32.u64.high %v1013_v53, %v334_v1, %v1163_v10  ;;  %715 = vperm.xlu0 %857, %v702_v62   ;;  %v330_v41 = vsel %vm324_vm9, %v327_v52, %v329_v50 }
  0xbd   :  { %v711_v17 = vadd.f32 %v710_v63, %v709_v44  ;;  %v756_v21 = vadd.f32 %v755_v6, %v754_v7  ;;  %v338_v59 = vsel %vm324_vm9, %v335_v57, %v337_v28  ;;  %v412_v2 = vshll.u32 %v904_v30, %v1015_v54 }
  0xbe   :  { %v1172_v9 = vmul.u32.u64.low %v1013_v53, %v338_v59  ;;  %v1173_v45 = vmul.u32.u64.high %v1013_v53, %v338_v59, %v1172_v9  ;;  %v413_v20 = vshrl.u32 %v905_v0, %v1048_v11  ;;  %v415_v22 = vshll.u32 %v905_v0, %v1015_v54 }
  0xbf   :  { %720 = vperm.xlu1 %858, %v711_v17   ;;  %v416_v19 = vshrl.u32 %v906_v16, %v1048_v11  ;;  %v418_v58 = vshll.u32 %v906_v16, %v1015_v54  ;;  %v419_v31 = vshrl.u32 %v907_v29, %v1048_v11  ;;  %v349_v23 = vadd.s32 1, %v1164_v12 }
  0xc0   :  { %v414_v32 = vor.u32 %v413_v20, %v412_v2  ;;  %v421_v14 = vshll.u32 %v907_v29, %v1015_v54  ;;  %v422_v33 = vshrl.u32 %v908_v24, %v1048_v11  ;;  %760 = vperm.xlu0 %857, %v747_v5   ;;  %v424_v26 = vshll.u32 %v908_v24, %v1015_v54 }
  0xc1   :  { %v417_v34 = vor.u32 %v416_v19, %v415_v22  ;;  %v420_v15 = vor.u32 %v419_v31, %v418_v58  ;;  %v425_v35 = vshrl.u32 %v909_v37, %v1048_v11  ;;  %v97_v3 = vand.u32 31, %v1113_v55 }
  0xc2   :  { %v346_v36 = vmul.u32 %v1013_v53, %v330_v41  ;;  %vm348_vm12 = vc.u32 %v1173_v45, %v1163_v10  ;;  %v423_v38 = vor.u32 %v422_v33, %v421_v14  ;;  %v411_v4 = vshrl.u32 %v904_v30, %v1048_v11 }
  0xc3   :  { %765 = vperm.xlu1 %858, %v756_v21   ;;  %v350_v39 = vsel %vm348_vm12, %v349_v23, %v1164_v12  ;;  %v426_v42 = vor.u32 %v425_v35, %v424_v26  ;;  %vm427_vm13 = vcmp.lt.s32.totalorder %v1042_v8, 1  ;;  %vm429_vm14 = vcmp.lt.s32.totalorder %v1042_v8, 3 }
  0xc4   :  { %v351_v54 = vadd.s32 %v350_v39, %v346_v36  ;;  %vm430_vm15 = vcmp.lt.s32.totalorder %v1042_v8, 4  ;;  %v435_v53 = vsel %vm427_vm13, %v414_v32, %v417_v34  ;;  %v439_v44 = vsel %vm427_vm13, %v417_v34, %v420_v15 }
  0xc5   :  { %v432_v52 = vsel %vm430_vm15, %v420_v15, 2102212464  ;;  %v436_v43 = vsel %vm430_vm15, %v423_v38, 920167782  ;;  %v440_v7 = vsel %vm430_vm15, %v426_v42, 1326507024  ;;  %v431_v63 = vsel %vm427_vm13, %v411_v4, %v414_v32 }
  0xc6   :  { %v352_v47 = vadd.s32 536870912, %v351_v54  ;;  %vm428_vm8 = vcmp.lt.s32.totalorder %v1042_v8, 2  ;;  %v437_v11 = vsel %vm429_vm14, %v420_v15, %v436_v43  ;;  %v441_v49 = vsel %vm429_vm14, %v423_v38, %v440_v7 }
  0xc7   :  { %v438_v50 = vsel %vm428_vm8, %v435_v53, %v437_v11  ;;  %v442_v51 = vsel %vm428_vm8, %v439_v44, %v441_v49  ;;  %v443_v57 = vshll.u32 %v403_v61, 8  ;;  %v191_v60 = vshrl.u32 %v190_v13, 23 }
  0xc8   :  { %v1219_v62 = vshrl.u32 %v352_v47, 30  ;;  %v433_v6 = vsel %vm429_vm14, %v417_v34, %v432_v52  ;;  %v98_v48 = vsub.s32 32, %v97_v3  ;;  %v83_v41 = vand.u32 2147483647, %v998_v46 }
  0xc9   :  { %v1225_v1 = vmul.u32.u64.low %v443_v57, %v442_v51  ;;  %v1226_v5 = vmul.u32.u64.high %v443_v57, %v442_v51, %v1225_v1  ;;  %v1228_v28 = vmul.u32.u64.low %v443_v57, %v438_v50  ;;  %v1229_v12 = vmul.u32.u64.high %v443_v57, %v438_v50, %v1228_v28 }
  0xca   :  { %v354_v61 = vshll.u32 %v1219_v62, 30  ;;  %v434_v17 = vsel %vm428_vm8, %v431_v63, %v433_v6  ;;  %v805_v21 = vadd.s32 4294967169, %v191_v60  ;;  %v101_v2 = vshrl.u32 %v905_v0, %v98_v48 }
  0xcb   :  { %vm452_vm6 = vc.u32 %v1226_v5, %v1228_v28  ;;  %v453_v8 = vadd.s32 1, %v1229_v12  ;;  %v450_v9 = vmul.u32 %v443_v57, %v434_v17  ;;  %v104_v20 = vshrl.u32 %v906_v16, %v98_v48 }
  0xcc   :  { %v1233_v13 = vsub.s32 %v351_v54, %v354_v61  ;;  %v96_v22 = vshrl.u32 %v1113_v55, 5  ;;  %v100_v58 = vshll.u32 %v904_v30, %v97_v3  ;;  %v107_v31 = vshrl.u32 %v907_v29, %v98_v48 }
  0xcd   :  { %v454_v19 = vsel %vm452_vm6, %v453_v8, %v1229_v12  ;;  %v103_v14 = vshll.u32 %v905_v0, %v97_v3  ;;  %v110_v33 = vshrl.u32 %v908_v24, %v98_v48  ;;  %v106_v34 = vshll.u32 %v906_v16, %v97_v3 }
  0xce   :  { %v357_v59 = vsub.s32 0, %v1233_v13  ;;  %v455_v32 = vadd.s32 %v454_v19, %v450_v9  ;;  %v109_v15 = vshll.u32 %v907_v29, %v97_v3  ;;  %v113_v26 = vshrl.u32 %v909_v37, %v98_v48 }
  0xcf   :  { %v90_v35 = vand.u32 8388607, %v83_v41  ;;  %v102_v36 = vor.u32 %v101_v2, %v100_v58  ;;  %v105_v38 = vor.u32 %v104_v20, %v103_v14  ;;  %v108_v4 = vor.u32 %v107_v31, %v106_v34 }
  0xd0   :  { %v810_v23 = vmin.u32 %v357_v59, %v1233_v13  ;;  %v456_v39 = vadd.s32 536870912, %v455_v32  ;;  %v111_v42 = vor.u32 %v110_v33, %v109_v15  ;;  %v112_v54 = vshll.u32 %v908_v24, %v97_v3 }
  0xd1   :  { %v197_v53 = vadd.s32 1, %v805_v21  ;;  %vm118_vm0 = vcmp.lt.s32.totalorder %v96_v22, 4  ;;  %v91_v47 = vor.u32 8388608, %v90_v35  ;;  %vm115_vm2 = vcmp.lt.s32.totalorder %v96_v22, 1 }
  0xd2   :  { %v359_v55 = vclz %v810_v23  ;;  %v1255_v43 = vshrl.u32 %v456_v39, 30  ;;  %v114_v44 = vor.u32 %v113_v26, %v112_v54  ;;  %v124_v7 = vsel %vm118_vm0, %v111_v42, 920167782 }
  0xd3   :  { %vm117_vm3 = vcmp.lt.s32.totalorder %v96_v22, 3  ;;  %v123_v49 = vsel %vm115_vm2, %v102_v36, %v105_v38  ;;  %vm198_vm4 = vcmp.gt.s32.totalorder %v197_v53, 0  ;;  %v127_v51 = vsel %vm115_vm2, %v105_v38, %v108_v4 }
  0xd4   :  { %v811_v52 = vadd.s32 4294967294, %v359_v55  ;;  %v458_v11 = vshll.u32 %v1255_v43, 30  ;;  %v125_v50 = vsel %vm117_vm3, %v108_v4, %v124_v7  ;;  %vm116_vm7 = vcmp.lt.s32.totalorder %v96_v22, 2 }
  0xd5   :  { %v120_v60 = vsel %vm118_vm0, %v108_v4, 2102212464  ;;  %v128_v63 = vsel %vm118_vm0, %v114_v44, 1326507024  ;;  %v99_v6 = vshrl.u32 %v904_v30, %v98_v48  ;;  %v126_v1 = vsel %vm116_vm7, %v123_v49, %v125_v50 }
  0xd6   :  { %vm812_vm1 = vcmp.lt.s32.totalorder %v811_v52, 0  ;;  %v1264_v57 = vsub.s32 %v455_v32, %v458_v11  ;;  %v129_v12 = vsel %vm117_vm3, %v111_v42, %v128_v63  ;;  %v131_v61 = vshll.u32 %v91_v47, 8 }
  0xd7   :  { %v1261_v3 = vsel %vm812_vm1, 0, %v811_v52  ;;  %v130_v8 = vsel %vm116_vm7, %v127_v51, %v129_v12  ;;  %v119_v59 = vsel %vm115_vm2, %v99_v6, %v102_v36  ;;  %v121_v9 = vsel %vm117_vm3, %v105_v38, %v120_v60 }
  0xd8   :  { %v367_v17 = vsub.s32 4294967266, %v1261_v3  ;;  %v461_v21 = vsub.s32 0, %v1264_v57  ;;  %v1276_v2 = vmul.u32.u64.low %v131_v61, %v130_v8  ;;  %v1277_v20 = vmul.u32.u64.high %v131_v61, %v130_v8, %v1276_v2 }
  0xd9   :  { %v199_v48 = vsel %vm198_vm4, %v197_v53, 0  ;;  %v1281_v58 = vmul.u32.u64.low %v131_v61, %v126_v1  ;;  %v1282_v31 = vmul.u32.u64.high %v131_v61, %v126_v1, %v1281_v58  ;;  %v122_v14 = vsel %vm116_vm7, %v119_v59, %v121_v9 }
  0xda   :  { %v814_v19 = vmin.u32 %v461_v21, %v1264_v57  ;;  %v368_v23 = vadd.s32 127, %v367_v17  ;;  %v201_v33 = vand.u32 31, %v199_v48  ;;  %v363_v26 = vsub.s32 32, %v1261_v3 }
  0xdb   :  { %vm140_vm5 = vc.u32 %v1277_v20, %v1281_v58  ;;  %v141_v15 = vadd.s32 1, %v1282_v31  ;;  %v138_v55 = vmul.u32 %v131_v61, %v122_v14  ;;  %v187_v38 = vand.u32 2147483647, %v1018_v56 }
  0xdc   :  { %v463_v32 = vclz %v814_v19  ;;  %v369_v35 = vshll.u32 %v368_v23, 23  ;;  %v202_v39 = vsub.s32 32, %v201_v33  ;;  %v347_v22 = vadd.s32 %v1163_v10, %v1173_v45 }
  0xdd   :  { %v142_v36 = vsel %vm140_vm5, %v141_v15, %v1282_v31  ;;  %v1294_v52 = vshrl.u32 %v199_v48, 5  ;;  %v451_v7 = vadd.s32 %v1228_v28, %v1226_v5  ;;  %v194_v50 = vand.u32 8388607, %v187_v38 }
  0xde   :  { %v815_v34 = vadd.s32 4294967294, %v463_v32  ;;  %v143_v42 = vadd.s32 %v142_v36, %v138_v55  ;;  %v365_v44 = vshrl.u32 %v347_v22, %v363_v26  ;;  %v370_v11 = vor.u32 4788187, %v369_v35 }
  0xdf   :  { %v204_v51 = vshll.u32 %v904_v30, %v201_v33  ;;  %v205_v45 = vshrl.u32 %v905_v0, %v202_v39  ;;  %v208_v63 = vshrl.u32 %v906_v16, %v202_v39  ;;  %v211_v1 = vshrl.u32 %v907_v29, %v202_v39 }
  0xe0   :  { %vm816_vm9 = vcmp.lt.s32.totalorder %v815_v34, 0  ;;  %v144_v47 = vadd.s32 536870912, %v143_v42  ;;  %v213_v5 = vshll.u32 %v907_v29, %v201_v33  ;;  %v214_v28 = vshrl.u32 %v908_v24, %v202_v39 }
  0xe1   :  { %v466_v4 = vsel %vm816_vm9, 0, %v815_v34  ;;  %v207_v17 = vshll.u32 %v905_v0, %v201_v33  ;;  %v217_v21 = vshrl.u32 %v909_v37, %v202_v39  ;;  %v210_v59 = vshll.u32 %v906_v16, %v201_v33 }
  0xe2   :  { %v467_v54 = vsub.s32 32, %v466_v4  ;;  %v471_v53 = vsub.s32 4294967266, %v466_v4  ;;  %v1301_v10 = vshrl.u32 %v144_v47, 30  ;;  %v468_v12 = vshll.u32 %v1264_v57, %v466_v4 }
  0xe3   :  { %v215_v9 = vor.u32 %v214_v28, %v213_v5  ;;  %v216_v2 = vshll.u32 %v908_v24, %v201_v33  ;;  %v364_v48 = vshll.u32 %v1233_v13, %v1261_v3  ;;  %v206_v31 = vor.u32 %v205_v45, %v204_v51 }
  0xe4   :  { %v472_v49 = vadd.s32 127, %v471_v53  ;;  %v469_v60 = vshrl.u32 %v451_v7, %v467_v54  ;;  %v146_v61 = vshll.u32 %v1301_v10, 30  ;;  %v209_v57 = vor.u32 %v208_v63, %v207_v17 }
  0xe5   :  { %v212_v23 = vor.u32 %v211_v1, %v210_v59  ;;  %v218_v32 = vor.u32 %v217_v21, %v216_v2  ;;  %v366_v14 = vor.u32 %v365_v44, %v364_v48  ;;  %v371_v0 = vand.u32 2147483647, %v370_v11 }
  0xe6   :  { %v473_v6 = vshll.u32 %v472_v49, 23  ;;  %v470_v29 = vor.u32 %v469_v60, %v468_v12  ;;  %v1316_v19 = vsub.s32 %v143_v42, %v146_v61  ;;  %vm222_vm10 = vcmp.lt.s32.totalorder %v1294_v52, 4 }
  0xe7   :  { %v195_v34 = vor.u32 8388608, %v194_v50  ;;  %v228_v24 = vsel %vm222_vm10, %v215_v9, 920167782  ;;  %vm219_vm11 = vcmp.lt.s32.totalorder %v1294_v52, 1  ;;  %vm221_vm12 = vcmp.lt.s32.totalorder %v1294_v52, 3 }
  0xe8   :  { %v474_v8 = vor.u32 4788187, %v473_v6  ;;  %v149_v37 = vsub.s32 0, %v1316_v19  ;;  %v477_v33 = vcvt.s32.f32 %v470_v29  ;;  %v227_v3 = vsel %vm219_vm11, %v206_v31, %v209_v57 }
  0xe9   :  { %v229_v15 = vsel %vm221_vm12, %v212_v23, %v228_v24  ;;  %v231_v26 = vsel %vm219_vm11, %v209_v57, %v212_v23  ;;  %v232_v55 = vsel %vm222_vm10, %v218_v32, 1326507024  ;;  %v373_v35 = vcvt.s32.f32 %v366_v14 }
  0xea   :  { %v475_v16 = vand.u32 2147483647, %v474_v8  ;;  %v802_v13 = vmin.u32 %v149_v37, %v1316_v19  ;;  %vm220_vm13 = vcmp.lt.s32.totalorder %v1294_v52, 2  ;;  %v224_v4 = vsel %vm222_vm10, %v212_v23, 2102212464 }
  0xeb   :  { %v233_v42 = vsel %vm221_vm12, %v215_v9, %v232_v55  ;;  %v235_v54 = vshll.u32 %v195_v34, 8  ;;  %v203_v44 = vshrl.u32 %v904_v30, %v202_v39  ;;  %v230_v7 = vsel %vm220_vm13, %v227_v3, %v229_v15 }
  0xec   :  { %v151_v36 = vclz %v802_v13  ;;  %v478_v22 = vmul.f32 %v477_v33, %v475_v16  ;;  %v234_v47 = vsel %vm220_vm13, %v231_v26, %v233_v42  ;;  %v374_v11 = vmul.f32 %v373_v35, %v371_v0 }
  0xed   :  { %v1343_v49 = vmul.u32.u64.low %v235_v54, %v234_v47  ;;  %v1344_v50 = vmul.u32.u64.high %v235_v54, %v234_v47, %v1343_v49  ;;  %v223_v51 = vsel %vm219_vm11, %v203_v44, %v206_v31  ;;  %v225_v60 = vsel %vm221_vm12, %v209_v57, %v224_v4 }
  0xee   :  { %v803_v53 = vadd.s32 4294967294, %v151_v36  ;;  %v479_v45 = vxor.u32 2147483648, %v478_v22  ;;  %v1350_v30 = vmul.u32.u64.low %v235_v54, %v230_v7  ;;  %v1351_v39 = vmul.u32.u64.high %v235_v54, %v230_v7, %v1350_v30 }
  0xef   :  { %v375_v5 = vxor.u32 2147483648, %v374_v11  ;;  %v226_v28 = vsel %vm220_vm13, %v223_v51, %v225_v60  ;;  %vm397_vm15 = vcmp.lt.s32.totalorder %v978_v25, 0  ;;  %v139_v12 = vadd.s32 %v1281_v58, %v1277_v20 }
  0xf0   :  { %vm804_vm14 = vcmp.lt.s32.totalorder %v803_v53, 0  ;;  %vm244_vm8 = vc.u32 %v1344_v50, %v1350_v30  ;;  %v480_v17 = vsel %vm397_vm15, %v479_v45, %v478_v22  ;;  %v245_v21 = vadd.s32 1, %v1351_v39 }
  0xf1   :  { %v154_v63 = vsel %vm804_vm14, 0, %v803_v53  ;;  %vm293_vm6 = vcmp.lt.s32.totalorder %v974_v18, 0  ;;  %v242_v52 = vmul.u32 %v235_v54, %v226_v28  ;;  %vm1369_vm0 = vcmp.le.f32.partialorder %v395_v40, 0.7853982 }
  0xf2   :  { %v155_v6 = vsub.s32 32, %v154_v63  ;;  %v159_v1 = vsub.s32 4294967266, %v154_v63  ;;  %v376_v9 = vsel %vm293_vm6, %v375_v5, %v374_v11  ;;  %v481_v58 = vsub.s32 4, %v1255_v43 }
  0xf3   :  { %v246_v2 = vsel %vm244_vm8, %v245_v21, %v1351_v39  ;;  %v483_v48 = vsel %vm1369_vm0, %v978_v25, %v480_v17  ;;  %v156_v29 = vshll.u32 %v1316_v19, %v154_v63  ;;  %vm1381_vm1 = vcmp.le.f32.partialorder %v291_v27, 0.7853982 }
  0xf4   :  { %v160_v61 = vadd.s32 127, %v159_v1  ;;  %v157_v8 = vshrl.u32 %v139_v12, %v155_v6  ;;  %v247_v57 = vadd.s32 %v246_v2, %v242_v52  ;;  %v377_v14 = vsub.s32 4, %v1219_v62 }
  0xf5   :  { %v379_v0 = vsel %vm1381_vm1, %v974_v18, %v376_v9  ;;  %859 = vcosq.f32 %v483_v48  ;;  %v482_v19 = vsel %vm397_vm15, %v481_v58, %v1255_v43  ;;  %vm85_vm2 = vcmp.lt.s32.totalorder %v998_v46, 0 }
  0xf6   :  { %v161_v59 = vshll.u32 %v160_v61, 23  ;;  %v158_v40 = vor.u32 %v157_v8, %v156_v29  ;;  %v248_v32 = vadd.s32 536870912, %v247_v57  ;;  %861 = vsinq.f32 %v483_v48  ;;  %v513_v48 = vpop.permute.xlu0 %512 }
  0xf7   :  { %863 = vcosq.f32 %v379_v0  ;;  %v484_v24 = vsel %vm1369_vm0, 0, %v482_v19  ;;  %v378_v33 = vsel %vm293_vm6, %v377_v14, %v1219_v62  ;;  %vm1407_vm4 = vcmp.le.f32.partialorder %v83_v41, 0.7853982 }
  0xf8   :  { %v162_v31 = vor.u32 4788187, %v161_v59  ;;  %v1392_v16 = vshrl.u32 %v248_v32, 30  ;;  %v165_v27 = vcvt.s32.f32 %v158_v40  ;;  %865 = vsinq.f32 %v379_v0  ;;  %v509_v40 = vpop.permute.xlu1 %508 }
  0xf9   :  { %v488_v15 = vadd.s32 3, %v484_v24  ;;  %v380_v26 = vsel %vm1381_vm1, 0, %v378_v33  ;;  %v243_v6 = vadd.s32 %v1350_v30, %v1344_v50  ;;  %v169_v41 = vsub.s32 4, %v1301_v10 }
  0xfa   :  { %v163_v37 = vand.u32 2147483647, %v162_v31  ;;  %v250_v34 = vshll.u32 %v1392_v16, 30  ;;  %v384_v4 = vadd.s32 3, %v380_v26  ;;  %vm487_vm13 = vweird.f32 %v978_v25 }
  0xfb   :  { %v489_v42 = vand.u32 3, %v488_v15  ;;  %v170_v50 = vsel %vm85_vm2, %v169_v41, %v1301_v10  ;;  %vm383_vm14 = vweird.f32 %v974_v18  ;;  %v273_v14 = vsub.s32 4, %v1392_v16 }
  0xfc   :  { %v166_v13 = vmul.f32 %v165_v27, %v163_v37  ;;  %v251_v3 = vsub.s32 %v247_v57, %v250_v34  ;;  %v385_v49 = vand.u32 3, %v384_v4  ;;  %v172_v29 = vsel %vm1407_vm4, 0, %v170_v50  ;;  %v821_v34 = vld [vmem:[%s1472_s1 + $0x4] ss:$0 sm:$0xff] }
  0xfd   :  { %vm491_vm3 = vcmp.eq.s32.totalorder %v489_v42, 0  ;;  %vm494_vm5 = vcmp.eq.s32.totalorder %v489_v42, 2  ;;  %vm490_vm11 = vcmp.lt.s32.totalorder %v489_v42, 2  ;;  %v176_v0 = vadd.s32 3, %v172_v29  ;;  %v819_v29 = vld [vmem:[%s1472_s1 + $0x2] ss:$0 sm:$0xff] }
  0xfe   :  { %v253_v43 = vsub.s32 0, %v251_v3  ;;  %v167_v55 = vxor.u32 2147483648, %v166_v13  ;;  %vm387_vm9 = vcmp.eq.s32.totalorder %v385_v49, 0  ;;  %vm390_vm10 = vcmp.eq.s32.totalorder %v385_v49, 2 }
  0xff   :  { %v860_v36 = vpop.eup %859  ;;  %vm386_vm12 = vcmp.lt.s32.totalorder %v385_v49, 2  ;;  %vm189_vm15 = vcmp.lt.s32.totalorder %v1018_v56, 0  ;;  %vm519_vm8 = vcmask 523264   ;;  %vm1428_vm6 = vcmp.le.f32.partialorder %v187_v38, 0.7853982 }
 0x100   :  { %v806_v35 = vmin.u32 %v253_v43, %v251_v3  ;;  %v862_v22 = vpop.eup %861  ;;  %v168_v62 = vsel %vm85_vm2, %v167_v55, %v166_v13  ;;  %v495_v11 = vxor.u32 2147483648, %v860_v36  ;;  %v274_v24 = vsel %vm189_vm15, %v273_v14, %v1392_v16 }
 0x101   :  { %v864_v53 = vpop.eup %863  ;;  %v492_v47 = vxor.u32 2147483648, %v862_v22  ;;  %v171_v45 = vsel %vm1407_vm4, %v998_v46, %v168_v62  ;;  %v177_v13 = vand.u32 3, %v176_v0  ;;  %v276_v38 = vsel %vm1428_vm6, 0, %v274_v24 }
 0x102   :  { %v255_v54 = vclz %v806_v35  ;;  %v866_v7 = vpop.eup %865  ;;  %v391_v60 = vxor.u32 2147483648, %v864_v53  ;;  %v496_v12 = vsel %vm494_vm5, %v495_v11, %v862_v22  ;;  %867 = vcosq.f32 %v171_v45  ;;  %v501_v22 = vpop.permute.xlu1 %500 }
 0x103   :  { %v388_v39 = vxor.u32 2147483648, %v866_v7  ;;  %v493_v28 = vsel %vm491_vm3, %v860_v36, %v492_v47  ;;  %869 = vsinq.f32 %v171_v45  ;;  %vm179_vm0 = vcmp.eq.s32.totalorder %v177_v13, 0 }
 0x104   :  { %v807_v44 = vadd.s32 4294967294, %v255_v54  ;;  %v392_v59 = vsel %vm390_vm10, %v391_v60, %v866_v7  ;;  %v497_v20 = vsel %vm490_vm11, %v493_v28, %v496_v12  ;;  %vm182_vm1 = vcmp.eq.s32.totalorder %v177_v13, 2 }
 0x105   :  { %v389_v8 = vsel %vm387_vm9, %v864_v53, %v388_v39  ;;  %v498_v2 = vsel %vm487_vm13, nan, %v497_v20  ;;  %v280_v36 = vadd.s32 3, %v276_v38  ;;  %vm178_vm2 = vcmp.lt.s32.totalorder %v177_v13, 2 }
 0x106   :  { %vm808_vm7 = vcmp.lt.s32.totalorder %v807_v44, 0  ;;  %v393_v58 = vsel %vm386_vm12, %v389_v8, %v392_v59  ;;  %v518_v10 = vmul.f32 %v513_v48, %v498_v2  ;;  %vm175_vm3 = vweird.f32 %v998_v46  ;;  %v505_v11 = vpop.permute.xlu1 %504  ;;  %v817_v8 = vld [vmem:[%s1472_s1] ss:$0 sm:$0xff] }
 0x107   :  { %v258_v63 = vsel %vm808_vm7, 0, %v807_v44  ;;  %v394_v23 = vsel %vm383_vm14, nan, %v393_v58  ;;  %v281_v54 = vand.u32 3, %v280_v36  ;;  %vm279_vm9 = vweird.f32 %v1018_v56 }
 0x108   :  { %v259_v1 = vsub.s32 32, %v258_v63  ;;  %v263_v5 = vsub.s32 4294967266, %v258_v63  ;;  %v260_v61 = vshll.u32 %v251_v3, %v258_v63  ;;  %v517_v25 = vmul.f32 %v509_v40, %v394_v23 }
 0x109   :  { %v530_v33 = vsel %vm519_vm8, %v518_v10, 0.0  ;;  %vm286_vm4 = vcmp.eq.s32.totalorder %v281_v54, 2  ;;  %vm283_vm7 = vcmp.eq.s32.totalorder %v281_v54, 0  ;;  %vm282_vm5 = vcmp.lt.s32.totalorder %v281_v54, 2 }
 0x10a   :  { %v261_v17 = vshrl.u32 %v243_v6, %v259_v1  ;;  %v264_v21 = vadd.s32 127, %v263_v5  ;;  %v529_v26 = vsel %vm519_vm8, %v517_v25, 0.0  ;;  %vm779_vm10 = vcmask 1041409  }
 0x10b   :  { %v531_v55 = vadd.f32 %v530_v33, %v529_v26  ;;  %vm782_vm11 = vcmask 517120  }
 0x10c   :  { %v262_v52 = vor.u32 %v261_v17, %v260_v61  ;;  %v265_v9 = vshll.u32 %v264_v21, 23  ;;  %v868_v19 = vpop.eup %867 }
 0x10d   :  { %v870_v27 = vpop.eup %869  ;;  %v183_v43 = vxor.u32 2147483648, %v868_v19  ;;  %v532_v4 = vrot.slane %v531_v55, 4 }
 0x10e   :  { %v266_v30 = vor.u32 4788187, %v265_v9  ;;  %v269_v57 = vcvt.s32.f32 %v262_v52  ;;  %v180_v15 = vxor.u32 2147483648, %v870_v27 }
 0x10f   :  { %v184_v35 = vsel %vm182_vm1, %v183_v43, %v870_v27  ;;  %v533_v62 = vadd.f32 %v532_v4, %v531_v55 }
 0x110   :  { %v267_v31 = vand.u32 2147483647, %v266_v30  ;;  %v181_v16 = vsel %vm179_vm0, %v868_v19, %v180_v15  ;;  %v818_v30 = vld [vmem:[%s1472_s1 + $0x1] ss:$0 sm:$0xff] }
 0x111   :  { %v185_v42 = vsel %vm178_vm2, %v181_v16, %v184_v35  ;;  %v534_v45 = vrot.slane %v533_v62, 2 }
 0x112   :  { %v270_v32 = vmul.f32 %v269_v57, %v267_v31  ;;  %v186_v44 = vsel %vm175_vm3, nan, %v185_v42 }
 0x113   :  { %v515_v51 = vmul.f32 %v501_v22, %v186_v44  ;;  %v535_v12 = vadd.f32 %v534_v45, %v533_v62 }
 0x114   :  { %v271_v37 = vxor.u32 2147483648, %v270_v32 }
 0x115   :  { %v520_v5 = vsel %vm519_vm8, %v515_v51, 0.0  ;;  %v536_v52 = vrot.slane %v535_v12, 1 }
 0x116   :  { %v272_v18 = vsel %vm189_vm15, %v271_v37, %v270_v32  ;;  %v820_v32 = vld [vmem:[%s1472_s1 + $0x3] ss:$0 sm:$0xff]  ;;  %s875_s1 = scalar_lea.vmem %s791_s6, 32 }
 0x117   :  { %v275_v3 = vsel %vm1428_vm6, %v1018_v56, %v272_v18  ;;  %v537_v2 = vadd.f32 %v536_v52, %v535_v12  ;;  %p876_p0 = scmp.ne.s32.totalorder %s791_s6, %s875_s1  ;;  %p881_p2 = scmp.lt.s32.totalorder %s875_s1, %s875_s1 }
 0x118   :  { %871 = vcosq.f32 %v275_v3 }
 0x119   :  { %873 = vsinq.f32 %v275_v3  ;;  %p882_p3 = por %p881_p2, %p880_p1 }
 0x11b   :  { %p883_p4 = pnand %p882_p3, %p876_p0 }
 0x122   :  { %v872_v53 = vpop.eup %871 }
 0x123   :  { %v874_v7 = vpop.eup %873  ;;  %v287_v47 = vxor.u32 2147483648, %v872_v53 }
 0x124   :  { %v284_v49 = vxor.u32 2147483648, %v874_v7 }
 0x125   :  { %v288_v60 = vsel %vm286_vm4, %v287_v47, %v874_v7 }
 0x126   :  { %v285_v63 = vsel %vm283_vm7, %v872_v53, %v284_v49 }
 0x127   :  { %v289_v6 = vsel %vm282_vm5, %v285_v63, %v288_v60 }
 0x128   :  { %v290_v46 = vsel %vm279_vm9, nan, %v289_v6 }
 0x129   :  { %v516_v28 = vmul.f32 %v505_v11, %v290_v46 }
 0x12b   :  { %v521_v61 = vsel %vm519_vm8, %v516_v28, 0.0 }
 0x12c   :  { %v522_v21 = vadd.f32 %v521_v61, %v520_v5 }
 0x12e   :  { %v586_v39 = vpop.permute.xlu0 %585  ;;  %v523_v59 = vrot.slane %v522_v21, 4 }
 0x12f   :  { %v581_v1 = vpop.permute.xlu1 %580  ;;  %v593_v50 = vmul.f32 %v817_v8, %v586_v39 }
 0x130   :  { %v524_v20 = vadd.f32 %v523_v59, %v522_v21  ;;  %v592_v0 = vmul.f32 %v817_v8, %v581_v1 }
 0x131   :  { %v595_v31 = vadd.f32 %v593_v50, %v537_v2 }
 0x132   :  { %v626_v41 = vpop.permute.xlu0 %625  ;;  %v525_v58 = vrot.slane %v524_v20, 2 }
 0x133   :  { %v631_v17 = vpop.permute.xlu1 %630  ;;  %v637_v33 = vmul.f32 %v818_v30, %v626_v41 }
 0x134   :  { %v638_v48 = vmul.f32 %v818_v30, %v631_v17  ;;  %v526_v57 = vadd.f32 %v525_v58, %v524_v20 }
 0x136   :  { %v671_v9 = vpop.permute.xlu0 %670  ;;  %v527_v10 = vrot.slane %v526_v57, 1  ;;  %v640_v19 = vadd.f32 %v638_v48, %v595_v31 }
 0x137   :  { %v676_v56 = vpop.permute.xlu1 %675  ;;  %v682_v3 = vmul.f32 %v819_v29, %v671_v9 }
 0x138   :  { %v683_v23 = vmul.f32 %v819_v29, %v676_v56  ;;  %v528_v27 = vadd.f32 %v527_v10, %v526_v57 }
 0x13a   :  { %v685_v25 = vadd.f32 %v683_v23, %v640_v19  ;;  %v594_v13 = vadd.f32 %v592_v0, %v528_v27 }
 0x13b   :  { %v716_v14 = vpop.permute.xlu0 %715 }
 0x13c   :  { %v639_v26 = vadd.f32 %v637_v33, %v594_v13  ;;  %v727_v38 = vmul.f32 %v820_v32, %v716_v14 }
 0x13e   :  { %v721_v40 = vpop.permute.xlu1 %720  ;;  %v684_v16 = vadd.f32 %v682_v3, %v639_v26 }
 0x13f   :  { %v728_v37 = vmul.f32 %v820_v32, %v721_v40  ;;  %v761_v43 = vpop.permute.xlu0 %760 }
 0x140   :  { %v772_v35 = vmul.f32 %v821_v34, %v761_v43  ;;  %v729_v36 = vadd.f32 %v727_v38, %v684_v16 }
 0x141   :  { %v730_v15 = vadd.f32 %v728_v37, %v685_v25 }
 0x142   :  { %v766_v18 = vpop.permute.xlu1 %765  ;;  %v774_v4 = vadd.f32 %v772_v35, %v729_v36 }
 0x143   :  { %v773_v24 = vmul.f32 %v821_v34, %v766_v18 }
 0x145   :  { %v775_v55 = vadd.f32 %v773_v24, %v730_v15 }
 0x147   :  { %v778_v22 = vrot.slane %v775_v55, 7 }
 0x149   :  { %v780_v42 = vsel %vm779_vm10, %v778_v22, %v774_v4 }
 0x14a   :  { %783 = vst.msk [vmem:[#allocation2] sm:$0x3] %vm782_vm11, %v780_v42 }
 0x14b   :  { %886 = shalt.err (!%p883_p4)
}
 0x14c   :  { %s887_s9 = scalar_lea.hbm %s1473_s2, 32 }
 0x14d   :  { %p888_p5 = scmp.ne.s32.totalorder %s1473_s2, %s887_s9  ;;  %p891_p6 = scmp.lt.u32.totalorder %s887_s9, %s1473_s2 }
 0x14f   :  { %p893_p7 = pnand %p891_p6, %p888_p5 }
 0x151   :  { %896 = shalt.err (!%p893_p7)
}
 0x152   :  { %793 = dma.vmem_to_hbm [thread:$0]  %s791_s6, 32, %s1473_s2, [#allocation3]  }
 0x153   :  { %897 = dma.done.wait [#allocation3], 32  }
 0x154   :  { %898 = vsyncadd [#allocation3], 4294967264 }
 0x155   :  { %797 = vsyncpa [#allocation3], 1 }

</bundles_post_ra>
